<compile_context>
chip_gen: v5e
topology: v5e:2x2
jax: 0.10.0
libtpu: 0.0.40
codegen_flags: <defaults>
</compile_context>

<pallas_src>
import math
from functools import partial

import jax
import jax.numpy as jnp
from jax import lax
from jax.experimental import pallas as pl
from jax.experimental.pallas import tpu as pltpu


# ---------------------------------------------------------------------------
# Kernel 1: bias-free linear projection  y = x @ W.T   (nn.Linear, bias=False)
# ---------------------------------------------------------------------------
def _linear_nobias_kernel(x_ref, w_ref, o_ref):
    # Contract the LAST dims of both operands == x @ W.T (no in-kernel
    # transpose; the MXU consumes the weight directly).
    dn = (((1,), (1,)), ((), ()))
    x = x_ref[...].astype(w_ref.dtype)          # f32 -> bf16 MXU operand
    o_ref[...] = lax.dot_general(
        x, w_ref[...], dn, preferred_element_type=jnp.float32
    ).astype(o_ref.dtype)


def _linear_nobias(x2d, w_bf16, *, out_dtype, row_tile=256):
    R, E_in = x2d.shape
    E_out = w_bf16.shape[0]
    tr = R if R <= row_tile else row_tile
    return pl.pallas_call(
        _linear_nobias_kernel,
        out_shape=jax.ShapeDtypeStruct((R, E_out), out_dtype),
        grid=(pl.cdiv(R, tr),),
        in_specs=[pl.BlockSpec((tr, E_in), lambda r: (r, 0)),
                  pl.BlockSpec((E_out, E_in), lambda r: (0, 0))],
        out_specs=pl.BlockSpec((tr, E_out), lambda r: (r, 0)),
        compiler_params=pltpu.CompilerParams(
            dimension_semantics=("parallel",)),
    )(x2d, w_bf16)


# ---------------------------------------------------------------------------
# Kernel 2: flash-style masked attention + fused output projection (w/ bias)
# ---------------------------------------------------------------------------
def _flash_attn_kernel(q_ref, k_ref, v_ref, bias_ref, wfc_ref, bfc_ref,
                       o_ref, m_sc, l_sc, acc_sc,
                       *, heads, head_dim, inv_sqrt_embed, mask_per_head):
    f32 = jnp.float32
    kv = pl.program_id(2)

    @pl.when(kv == 0)
    def _init():
        m_sc[...] = jnp.full(m_sc.shape, -jnp.inf, dtype=m_sc.dtype)
        l_sc[...] = jnp.zeros(l_sc.shape, dtype=l_sc.dtype)
        acc_sc[...] = jnp.zeros(acc_sc.shape, dtype=acc_sc.dtype)

    dn_t = (((1,), (1,)), ((), ()))              # contract last dims: a @ b.T

    # Fold the reference's 1/sqrt(E) logits scale into q, once for all heads
    # and all keys (sentinel becomes -1e20 instead of -1e20/sqrt(E); the
    # softmax output is unchanged).
    q = (q_ref[0].astype(f32) * inv_sqrt_embed).astype(k_ref.dtype)   # (TQ,E)
    k = k_ref[0]                                                      # (TK,E)
    v = v_ref[0]                                                      # (TK,E)

    if not mask_per_head:
        bias_shared = bias_ref[0, 0].astype(f32)                      # (TQ,TK)

    ctx_parts, alpha_parts = [], []
    for h in range(heads):                       # static -> fully unrolled
        s = h * head_dim
        qh = q[:, s:s + head_dim]                # (TQ, D)
        kh = k[:, s:s + head_dim]                # (TK, D)
        vh = v[:, s:s + head_dim]                # (TK, D)
        bias = bias_ref[0, h].astype(f32) if mask_per_head else bias_shared

        # energy + additive mask bias (one VALU add; no cmp/select/mul here)
        e = lax.dot_general(qh, kh, dn_t, preferred_element_type=f32) + bias

        m_prev = m_sc[:, h:h + 1]                                     # (TQ,1)
        m_new = jnp.maximum(m_prev, jnp.max(e, axis=-1, keepdims=True))
        alpha = jnp.exp(m_prev - m_new)
        p = jnp.exp(e - m_new)                                        # (TQ,TK)

        l_sc[:, h:h + 1] = alpha * l_sc[:, h:h + 1] + jnp.sum(
            p, axis=-1, keepdims=True)
        m_sc[:, h:h + 1] = m_new

        ctx_parts.append(jnp.dot(p.astype(v.dtype), vh,
                                 preferred_element_type=f32))         # (TQ,D)
        alpha_parts.append(jnp.broadcast_to(alpha, (alpha.shape[0], head_dim)))

    # Single lane-dense (TQ, E) accumulator update instead of H narrow
    # (TQ, head_dim) partial stores.
    acc_sc[...] = (jnp.concatenate(alpha_parts, axis=-1) * acc_sc[...]
                   + jnp.concatenate(ctx_parts, axis=-1))

    @pl.when(kv == pl.num_programs(2) - 1)
    def _finalize():
        tq = acc_sc.shape[0]
        l_full = jnp.concatenate(
            [jnp.broadcast_to(l_sc[:, h:h + 1], (tq, head_dim))
             for h in range(heads)], axis=-1)                         # (TQ,E)
        ctx = acc_sc[...] * pl.reciprocal(l_full, approx=True)        # (TQ,E)
        # Fused output projection (one big MXU contraction over E) + bias.
        o_ref[0] = (lax.dot_general(ctx.astype(wfc_ref.dtype), wfc_ref[...],
                                    dn_t, preferred_element_type=f32)
                    + bfc_ref[...]).astype(o_ref.dtype)


# ---------------------------------------------------------------------------
# Wrapper (mirrors SelfAttention.forward)
# ---------------------------------------------------------------------------
def _divisor_tile(length, target):
    """Largest tile <= target dividing `length` (avoids garbage-padded K/V
    columns entering the online softmax). Falls back to `length`."""
    if length <= target:
        return length
    for t in range(target, 0, -1):
        if length % t == 0:
            return t
    return length
    # TODO(synk): for ragged lengths, mask padded K/V columns in-kernel with
    #             a broadcasted_iota bound instead of requiring divisibility.


def self_attention_forward(params, values, keys, query, mask,
                           *, q_tile=256, kv_tile=512):
    N, Lv, E = values.shape
    Lk = keys.shape[1]
    Lq = query.shape[1]
    H = int(params["heads"])
    D = E // H
    assert D * H == E, "embed_size must be divisible by heads"
    assert Lv == Lk, "values/keys sequence lengths must match"

    bf16, f32 = jnp.bfloat16, jnp.float32
    w_v = params["w_v"].astype(bf16)
    w_k = params["w_k"].astype(bf16)
    w_fc = params["w_fc"].astype(bf16)
    b_fc = params["b_fc"].reshape(1, E).astype(f32)
    # params["w_q"] is kept for state-dict parity but (like the PyTorch
    # reference, whose projected queries are immediately discarded) unused.

    # 1) K / V projections hoisted out of the attention kernel: computed once
    #    per token (not per query tile), stored in bf16 (half the HBM bytes).
    v_proj = _linear_nobias(values.reshape(N * Lv, E), w_v,
                            out_dtype=bf16).reshape(N, Lv, E)
    k_proj = _linear_nobias(keys.reshape(N * Lk, E), w_k,
                            out_dtype=bf16).reshape(N, Lk, E)

    # Tile sizes: MXU-friendly targets (>=256 when sequences are long), but
    # exact divisors of the sequence lengths.
    TQ = _divisor_tile(Lq, q_tile)
    TK = _divisor_tile(Lk, kv_tile)
    n_q, n_k = Lq // TQ, Lk // TK

    # 2) Mask -> additive bias (bf16: half the DMA of f32), computed once and
    #    NEVER broadcast to (N, H, Lq, Lk) in HBM; block reuse via index_map.
    if mask is None:
        mask_per_head = False
        mh_blk = 1
        bias = jnp.zeros((1, 1, TQ, TK), dtype=bf16)
        bias_idx = lambda n, qi, ki: (0, 0, 0, 0)
    else:
        Mb, Mh = mask.shape[0], mask.shape[1]
        assert Mb in (1, N), f"mask batch dim must be 1 or {N}, got {Mb}"
        assert Mh in (1, H), f"mask head dim must be 1 or {H}, got {Mh}"
        assert mask.shape[2] == Lq and mask.shape[3] == Lk
        mask_per_head = Mh != 1
        mh_blk = Mh
        # Exact 0/1-mask comparison, matching torch masked_fill(mask == 0, .).
        bias = jnp.where(mask == 0, -1e20, 0.0).astype(bf16)
        if Mb == 1:
            bias_idx = lambda n, qi, ki: (0, 0, qi, ki)
        else:
            bias_idx = lambda n, qi, ki: (n, 0, qi, ki)

    # VMEM budget derived from the block sizes (double-buffered inputs/output
    # + f32 scratch), clamped to sane limits across generations.
    block_bytes = (TQ * E * 4              # q tile (f32)
                   + 2 * TK * E * 2        # k/v tiles (bf16)
                   + mh_blk * TQ * TK * 2  # mask-bias tile (bf16)
                   + E * E * 2 + E * 4     # w_fc (bf16) + b_fc (f32)
                   + TQ * E * 4)           # output tile (f32)
    scratch_bytes = TQ * E * 4 + 2 * TQ * max(H, 128) * 4
    vmem_limit = int(min(max(2.5 * block_bytes + scratch_bytes + (2 << 20),
                             32 << 20), 128 << 20))

    kernel = partial(_flash_attn_kernel, heads=H, head_dim=D,
                     inv_sqrt_embed=1.0 / math.sqrt(E),
                     mask_per_head=mask_per_head)

    return pl.pallas_call(
        kernel,
        out_shape=jax.ShapeDtypeStruct((N, Lq, E), f32),
        grid=(N, n_q, n_k),
        in_specs=[
            pl.BlockSpec((1, TQ, E), lambda n, qi, ki: (n, qi, 0)),   # raw query
            pl.BlockSpec((1, TK, E), lambda n, qi, ki: (n, ki, 0)),   # k_proj
            pl.BlockSpec((1, TK, E), lambda n, qi, ki: (n, ki, 0)),   # v_proj
            pl.BlockSpec((1, mh_blk, TQ, TK), bias_idx),              # mask bias
            pl.BlockSpec((E, E), lambda n, qi, ki: (0, 0)),           # w_fc
            pl.BlockSpec((1, E), lambda n, qi, ki: (0, 0)),           # b_fc
        ],
        out_specs=pl.BlockSpec((1, TQ, E), lambda n, qi, ki: (n, qi, 0)),
        scratch_shapes=[pltpu.VMEM((TQ, H), f32),    # running max (per head)
                        pltpu.VMEM((TQ, H), f32),    # running sum (per head)
                        pltpu.VMEM((TQ, E), f32)],   # running context
        compiler_params=pltpu.CompilerParams(
            dimension_semantics=("parallel", "parallel", "arbitrary"),
            vmem_limit_bytes=vmem_limit),
    )(query, k_proj, v_proj, bias, w_fc, b_fc)


# ---------------------------------------------------------------------------
# Pure-JAX reference (all-f32, mirrors the PyTorch module exactly)
# ---------------------------------------------------------------------------
def self_attention_ref(params, values, keys, query, mask):
    N, Lv, E = values.shape
    Lk, Lq = keys.shape[1], query.shape[1]
    H = params["heads"]
    D = E // H
    v = (values @ params["w_v"].T).reshape(N, Lv, H, D)
    k = (keys @ params["w_k"].T).reshape(N, Lk, H, D)
    q = query.reshape(N, Lq, H, D)  # reference quirk: raw query
    energy = jnp.einsum("nqhd,nkhd->nhqk", q, k)
    energy = jnp.where(jnp.broadcast_to(mask, energy.shape) == 0,
                       jnp.float32(-1e20), energy)
    attn = jax.nn.softmax(energy / math.sqrt(E), axis=3)
    out = jnp.einsum("nhqk,nkhd->nqhd", attn, v).reshape(N, Lq, H * D)
    return out @ params["w_fc"].T + params["b_fc"]


if __name__ == "__main__":
    N, L, E, H = 2, 8, 32, 4

    key = jax.random.PRNGKey(0)
    kv, kk, kq, kwv, kwk, kwq, kwf, kbf = jax.random.split(key, 8)

    values = jax.random.normal(kv, (N, L, E), dtype=jnp.float32)
    keys_in = jax.random.normal(kk, (N, L, E), dtype=jnp.float32)
    query = jax.random.normal(kq, (N, L, E), dtype=jnp.float32)
    # Causal mask, broadcastable to (N, H, Q, K)
    mask = jnp.tril(jnp.ones((L, L), dtype=jnp.float32))[None, None, :, :]

    params = {
        "heads": H,
        "w_v": jax.random.normal(kwv, (E, E), dtype=jnp.float32) * 0.05,
        "w_k": jax.random.normal(kwk, (E, E), dtype=jnp.float32) * 0.05,
        "w_q": jax.random.normal(kwq, (E, E), dtype=jnp.float32) * 0.05,
        "w_fc": jax.random.normal(kwf, (E, E), dtype=jnp.float32) * 0.05,
        "b_fc": jax.random.normal(kbf, (E,), dtype=jnp.float32) * 0.05,
    }

    out = self_attention_forward(params, values, keys_in, query, mask)
    out = jax.block_until_ready(out)

    ref = self_attention_ref(params, values, keys_in, query, mask)
    assert out.shape == (N, L, E)
    # bf16 MXU operands + approx (EUP) softmax reciprocal => looser tolerance
    # than the all-f32 reference (per the perf review's bf16 recommendation).
    err = float(jnp.max(jnp.abs(out - ref)))
    assert err < 2e-2, f"mismatch vs reference: max abs err {err}"

    print("KERNEL_OK")
</pallas_src>

<mosaic_0001>
module attributes {stable_mosaic.version = 11 : i64} {
  func.func @_linear_nobias_kernel(%arg0: i32, %arg1: memref<16x32xf32, #tpu.memory_space<vmem>>, %arg2: memref<32x32xbf16, #tpu.memory_space<vmem>>, %arg3: memref<16x32xbf16, #tpu.memory_space<vmem>>) attributes {dimension_semantics = [#tpu.dimension_semantics<parallel>], iteration_bounds = array<i64: 1>, scalar_prefetch = 0 : i64, scratch_operands = 0 : i64, tpu.core_type = #tpu.core_type<tc>, window_params = [{transform_indices = @transform_0, window_bounds = array<i64: 16, 32>}, {pipeline_mode = #tpu.pipeline_mode<synchronous>, transform_indices = @transform_1, window_bounds = array<i64: 32, 32>}, {transform_indices = @transform_2, window_bounds = array<i64: 16, 32>}]} {
    %c0 = arith.constant 0 : index
    %c0_0 = arith.constant 0 : index
    %0 = vector.load %arg1[%c0, %c0_0] : memref<16x32xf32, #tpu.memory_space<vmem>>, vector<16x32xf32>
    %1 = arith.truncf %0 : vector<16x32xf32> to vector<16x32xbf16>
    %c0_1 = arith.constant 0 : index
    %c0_2 = arith.constant 0 : index
    %2 = vector.load %arg2[%c0_1, %c0_2] : memref<32x32xbf16, #tpu.memory_space<vmem>>, vector<32x32xbf16>
    %cst = arith.constant dense<0.000000e+00> : vector<16x32xf32>
    %3 = tpu.matmul %1, %2, %cst {dimension_numbers = #tpu.dot_dimension_numbers<[1], [1], [0], [0], [0, 0, 1, 0], [], []>} : vector<16x32xbf16>, vector<32x32xbf16>, vector<16x32xf32> -> vector<16x32xf32>
    %4 = arith.truncf %3 : vector<16x32xf32> to vector<16x32xbf16>
    %c0_3 = arith.constant 0 : index
    %c0_4 = arith.constant 0 : index
    %5 = vector.load %arg3[%c0_3, %c0_4] : memref<16x32xbf16, #tpu.memory_space<vmem>>, vector<16x32xbf16>
    tpu.vector_store %arg3[%c0_3, %c0_4], %4 {strides = array<i32>} : memref<16x32xbf16, #tpu.memory_space<vmem>>, vector<16x32xbf16>,
    return
  }
  func.func @transform_0(%arg0: i32) -> (i32, i32) {
    %c0_i32 = arith.constant 0 : i32
    %c0_i32_0 = arith.constant 0 : i32
    return %arg0, %c0_i32 : i32, i32
  }
  func.func @transform_1(%arg0: i32) -> (i32, i32) {
    %c0_i32 = arith.constant 0 : i32
    %c0_i32_0 = arith.constant 0 : i32
    %c0_i32_1 = arith.constant 0 : i32
    return %c0_i32, %c0_i32_0 : i32, i32
  }
  func.func @transform_2(%arg0: i32) -> (i32, i32) {
    %c0_i32 = arith.constant 0 : i32
    %c0_i32_0 = arith.constant 0 : i32
    return %arg0, %c0_i32 : i32, i32
  }
}

</mosaic_0001>

<bundles_post_ra>
// kernel: tpu_custom_call.1
= control target key start
LH: loop header
LB: loop body
LE: loop exit
PB: predicated region body
PF: predicated region fallthrough
CT: control target
= control target key end

     0   :  { %7 = vsyncpa [#allocation3], 0  ;;  %s244_s0 = inlined_call_operand.hbm [shape: f32[16,32], index: 0, kind: input, shape index: {}]   ;;  %s245_s1 = inlined_call_operand.hbm [shape: bf16[32,32], index: 1, kind: input, shape index: {}]   ;;  %s246_s2 = inlined_call_operand.hbm [shape: bf16[16,32], index: 2, kind: output, shape index: {}]  }
   0x1   :  { %8 = vsyncpa [#allocation6], 0 }
   0x2   :  { %9 = vsyncpa [#allocation4], 0  ;;  %s14_s11 = sshll.u32 %s244_s0, 4  ;;  %s207_s12 = smov [#allocation2]   ;;  %s15_s11 = int_to_ptr.hbm [resolvable:$true] %s14_s11 }
   0x3   :  { %s16_s13 = sshll.u32 %s207_s12, 4  ;;  %s27_s16 = sshll.u32 %s245_s1, 4  ;;  %s17_s13 = int_to_ptr.vmem [resolvable:$true] %s16_s13  ;;  %s28_s16 = int_to_ptr.hbm [resolvable:$true] %s27_s16 }
   0x4   :  { %s208_s17 = smov 128   ;;  %s209_s18 = smov 8  }
   0x5   :  { %22 = dma.hbm_to_vmem [thread:$0]  %s15_s11, 256, %s17_s13, [#allocation3], %s208_s17, %s208_s17, %s209_s18  }
   0x6   :  { %s210_s19 = smov [#allocation5]   ;;  %s211_s21 = smov 64  }
   0x7   :  { %s29_s20 = sshll.u32 %s210_s19, 4  ;;  %s212_s22 = smov 4   ;;  %s30_s20 = int_to_ptr.vmem [resolvable:$true] %s29_s20 }
   0x8   :  { %35 = dma.hbm_to_vmem [thread:$0]  %s28_s16, 256, %s30_s20, [#allocation6], %s211_s21, %s211_s21, %s212_s22  }
   0x9   :  { %201 = dma.done.wait [#allocation3], 256  }
   0xa   :  { %202 = vsyncadd [#allocation3], 4294967040 }
   0xb   :  { %203 = dma.done.wait [#allocation6], 256  }
   0xc   :  { %204 = vsyncadd [#allocation6], 4294967040  ;;  %vm62_vm0 = vcmask 261120   ;;  %v121_v0 = vld [vmem:[#allocation5 + $0x8] sm:$0xff]  ;;  %v120_v2 = vld [vmem:[#allocation5] sm:$0xff]  ;;  %vm88_vm1 = vcmask 257024  }
   0xd   :  { %v70_v1 = vsel %vm62_vm0, %v121_v0, 0  ;;  %v67_v3 = vsel %vm62_vm0, %v120_v2, 0  ;;  %v45_v4 = vld [vmem:[#allocation2] sm:$0xff]  ;;  %v46_v5 = vld [vmem:[#allocation2 + $0x8] sm:$0xff]  ;;  %s213_s0 = smov [#allocation7]   ;;  %s97_s25 = sshll.u32 %s246_s2, 4  ;;  %s98_s25 = int_to_ptr.hbm [resolvable:$true] %s97_s25 }
   0xe   :  { %78 = vmatpush.bf16.xpose.msra.mxu0 %v70_v1  ;;  %v47_v6 = vpack.c.bf16 %v46_v5, %v45_v4  ;;  %s95_s1 = sshll.u32 %s213_s0, 4  ;;  %s96_s1 = int_to_ptr.vmem [resolvable:$true] %s95_s1 }
  0x16   :  { %79 = vmatpush.bf16.xpose.msra.mxu0 %v67_v3 }
  0x1d   :  { %119 = vmatmul.msk.bf16.vlgmr.msra.gmra.mxu0 %vm62_vm0, %v47_v6 }
  0x9a   :  { %v81_v7 = vpop.f32.mrf.mxu0 }
  0x9b   :  { %v86_v8 = vpack.c.bf16 %v81_v7, %v81_v7 }
  0x9d   :  { %89 = vst.msk [vmem:[#allocation7] sm:$0xf] %vm88_vm1, %v86_v8 }
  0xa2   :  { %v83_v9 = vpop.f32.mrf.mxu0 }
  0xa3   :  { %v87_v10 = vpack.c.bf16 %v83_v9, %v83_v9 }
  0xa5   :  { %90 = vst.msk [vmem:[#allocation7 + $0x4] sm:$0xf] %vm88_vm1, %v87_v10 }
  0xa6   :  { %103 = dma.vmem_to_hbm [thread:$0]  %s96_s1, 128, %s98_s25, [#allocation4], %s211_s21, %s211_s21, %s212_s22  }
  0xa7   :  { %205 = dma.done.wait [#allocation4], 128  }
  0xa8   :  { %206 = vsyncadd [#allocation4], 4294967168 }
  0xa9   :  { %108 = vsyncpa [#allocation3], 1 }
  0xaa   :  { %109 = vsyncpa [#allocation6], 1 }
  0xab   :  { %110 = vsyncpa [#allocation4], 1 }

</bundles_post_ra>
